<compile_context>
chip_gen: v6e
topology: v6e:2x2x1
jax: 0.10.0
libtpu: 0.0.40
codegen_flags: <defaults>
</compile_context>

<pallas_src>
import functools

import jax
import jax.numpy as jnp
from jax.experimental import pallas as pl
from jax.experimental.pallas import tpu as pltpu


def _round_up(x, m):
    return ((x + m - 1) // m) * m


def f_conv_forward(z, w0, b0, w_mid, b_mid, w_out, b_out, *, tm=4096, out_dtype=None):
    """Fused forward of f_conv.

    z     : (B, N, C) activations, C == hidden_channels.
    w0    : (C, C), b0: (C,)                          start_conv
    w_mid : (L-1, C, C), b_mid: (L-1, C)              self.linears (L-1 may be 0)
    w_out : (input_dim*C, C), b_out: (input_dim*C,)   linear_out
    Returns (B, N, C, input_dim), matching
      linear_out(...).squeeze().transpose(1,2).view(B, N, C, input_dim).tanh().

    Matmul operands are fed to the MXU in bf16 (f32 accumulation + f32 epilogue);
    the output is stored in `out_dtype` (default: z.dtype).
    """
    B, N, C = z.shape
    K_out = w_out.shape[0]
    input_dim = K_out // C
    n_mid = int(w_mid.shape[0]) if w_mid is not None else 0
    out_dtype = z.dtype if out_dtype is None else out_dtype

    M = B * N

    # Row tile: big enough to amortize per-step overhead, but guarantee >= ~4 grid
    # steps (2 per TensorCore on v7x) when M is small so the "parallel" axis can
    # actually split across cores and the input/output DMAs double-buffer.
    tm = max(8, min(tm, _round_up(pl.cdiv(M, 4), 8)))
    grid_m = pl.cdiv(M, tm)            # ragged last block handled by Pallas

    # Lane-density guard for the (dominant) output stream: pad K_out to a multiple
    # of 128 inside the kernel, slice it off outside.  (128 already for the example.)
    K_pad = _round_up(K_out, 128)

    x2 = z.reshape(M, C)

    # Kernel computes x @ W^T, so pass the transposed (in, out) weights, in bf16.
    # TODO(synk): if hidden_channels were large (weights >> VMEM) this would need a
    # K-reduction grid axis with an accumulator instead of resident weights.
    w0_t = jnp.asarray(w0).T.astype(jnp.bfloat16)                 # (C, C)
    b0_2 = jnp.asarray(b0).reshape(1, C).astype(jnp.float32)
    wout_t = jnp.asarray(w_out).T.astype(jnp.bfloat16)            # (C, K_out)
    bout_2 = jnp.asarray(b_out).reshape(1, K_out).astype(jnp.float32)
    if K_pad != K_out:
        wout_t = jnp.pad(wout_t, ((0, 0), (0, K_pad - K_out)))
        bout_2 = jnp.pad(bout_2, ((0, 0), (0, K_pad - K_out)))
    if n_mid > 0:
        wmid_t = jnp.swapaxes(jnp.asarray(w_mid), 1, 2).astype(jnp.bfloat16)  # (L-1,C,C)
        bmid_2 = jnp.asarray(b_mid).reshape(n_mid, 1, C).astype(jnp.float32)

    def kernel(*refs):
        x_ref, w0_ref, b0_ref = refs[0], refs[1], refs[2]
        idx = 3
        if n_mid > 0:
            wm_ref, bm_ref = refs[3], refs[4]
            idx = 5
        wout_ref, bout_ref, o_ref = refs[idx], refs[idx + 1], refs[idx + 2]

        # bf16 operands into the MXU, f32 accumulation, f32 bias/ReLU/tanh epilogue.
        x = x_ref[...].astype(jnp.bfloat16)
        y = jnp.dot(x, w0_ref[...], preferred_element_type=jnp.float32)
        y = jnp.maximum(y + b0_ref[...], 0.0)
        for l in range(n_mid):                       # static unroll: small layer count
            y = jnp.dot(y.astype(jnp.bfloat16), wm_ref[l],
                        preferred_element_type=jnp.float32)
            y = jnp.maximum(y + bm_ref[l], 0.0)
        out = jnp.dot(y.astype(jnp.bfloat16), wout_ref[...],
                      preferred_element_type=jnp.float32)
        # TODO(synk): on v5e, if profiling shows the single EUP port binding after the
        # bf16 matmul fix, replace jnp.tanh with a VPU polynomial approximation.
        out = jnp.tanh(out + bout_ref[...])
        o_ref[...] = out.astype(o_ref.dtype)

    in_specs = [
        pl.BlockSpec((tm, C), lambda i: (i, 0)),       # streamed activation rows
        pl.BlockSpec((C, C), lambda i: (0, 0)),        # W0^T (VMEM-resident)
        pl.BlockSpec((1, C), lambda i: (0, 0)),        # b0
    ]
    inputs = [x2, w0_t, b0_2]
    if n_mid > 0:
        in_specs += [
            pl.BlockSpec((n_mid, C, C), lambda i: (0, 0, 0)),   # stacked hidden W^T
            pl.BlockSpec((n_mid, 1, C), lambda i: (0, 0, 0)),   # stacked hidden b
        ]
        inputs += [wmid_t, bmid_2]
    in_specs += [
        pl.BlockSpec((C, K_pad), lambda i: (0, 0)),    # Wout^T (VMEM-resident)
        pl.BlockSpec((1, K_pad), lambda i: (0, 0)),    # bout
    ]
    inputs += [wout_t, bout_2]

    in_itemsize = jnp.dtype(z.dtype).itemsize
    out_itemsize = jnp.dtype(out_dtype).itemsize
    cost = pl.CostEstimate(
        flops=2 * M * C * (C * (1 + n_mid) + K_pad),
        transcendentals=M * K_pad,
        bytes_accessed=in_itemsize * M * C + out_itemsize * M * K_pad
        + 2 * (C * C * (1 + n_mid) + C * K_pad)       # bf16 weights
        + 4 * (C * (1 + n_mid) + K_pad),              # f32 biases
    )

    out = pl.pallas_call(
        kernel,
        out_shape=jax.ShapeDtypeStruct((M, K_pad), out_dtype),
        grid_spec=pltpu.PrefetchScalarGridSpec(
            num_scalar_prefetch=0,
            grid=(grid_m,),
            in_specs=in_specs,
            out_specs=pl.BlockSpec((tm, K_pad), lambda i: (i, 0)),
        ),
        compiler_params=pltpu.CompilerParams(
            dimension_semantics=("parallel",),         # row tiles shard across TCs on v7x
            vmem_limit_bytes=32 * 1024 * 1024,         # safe for tm=4096 even on v5e
        ),
        cost_estimate=cost,
    )(*inputs)

    if K_pad != K_out:
        out = out[:, :K_out]
    out = out.reshape(B, N, C, input_dim)
    # TODO(synk): PyTorch's .squeeze() would also drop B or N when they equal 1;
    # this wrapper always returns (B, N, hidden_channels, input_dim).
    return out


def make_params(key, input_dim, hidden_channels, num_hidden_layers):
    """Deterministic Conv2d(1x1)-style parameter init (fan_in = hidden_channels)."""
    C = hidden_channels
    n_mid = num_hidden_layers - 1
    ks = jax.random.split(key, 6)
    bound = 1.0 / jnp.sqrt(jnp.float32(C))
    w0 = jax.random.uniform(ks[0], (C, C), jnp.float32, -bound, bound)
    b0 = jax.random.uniform(ks[1], (C,), jnp.float32, -bound, bound)
    if n_mid > 0:
        w_mid = jax.random.uniform(ks[2], (n_mid, C, C), jnp.float32, -bound, bound)
        b_mid = jax.random.uniform(ks[3], (n_mid, C), jnp.float32, -bound, bound)
    else:
        w_mid = jnp.zeros((0, C, C), jnp.float32)
        b_mid = jnp.zeros((0, C), jnp.float32)
    w_out = jax.random.uniform(ks[4], (input_dim * C, C), jnp.float32, -bound, bound)
    b_out = jax.random.uniform(ks[5], (input_dim * C,), jnp.float32, -bound, bound)
    return w0, b0, w_mid, b_mid, w_out, b_out


if __name__ == "__main__":
    key = jax.random.PRNGKey(0)
    kz, kp = jax.random.split(key)

    # f_conv(input_dim=4, hidden_channels=32, hidden_hidden_channels=64, num_hidden_layers=2)
    # (hidden_hidden_channels is stored by the module but unused by its layers.)
    B, N = 2, 16
    input_dim, hidden_channels, num_hidden_layers = 4, 32, 2

    z = jax.random.normal(kz, (B, N, hidden_channels), dtype=jnp.float32)
    w0, b0, w_mid, b_mid, w_out, b_out = make_params(
        kp, input_dim, hidden_channels, num_hidden_layers)

    run = jax.jit(functools.partial(f_conv_forward, tm=4096))
    out = run(z, w0, b0, w_mid, b_mid, w_out, b_out)
    jax.block_until_ready(out)
    assert out.shape == (B, N, hidden_channels, input_dim)

    # Reference 1: same math / precision as the kernel (bf16 operands, f32 accum).
    x2 = z.reshape(B * N, hidden_channels)
    y = jnp.dot(x2.astype(jnp.bfloat16), w0.T.astype(jnp.bfloat16),
                preferred_element_type=jnp.float32)
    y = jnp.maximum(y + b0, 0.0)
    for l in range(num_hidden_layers - 1):
        y = jnp.dot(y.astype(jnp.bfloat16), w_mid[l].T.astype(jnp.bfloat16),
                    preferred_element_type=jnp.float32)
        y = jnp.maximum(y + b_mid[l], 0.0)
    ref_bf16 = jnp.tanh(jnp.dot(y.astype(jnp.bfloat16), w_out.T.astype(jnp.bfloat16),
                                preferred_element_type=jnp.float32) + b_out)
    ref_bf16 = ref_bf16.reshape(B, N, hidden_channels, input_dim)

    # Reference 2: full f32 math (the PyTorch module's precision) for a looser check.
    y32 = jnp.maximum(x2 @ w0.T + b0, 0.0)
    for l in range(num_hidden_layers - 1):
        y32 = jnp.maximum(y32 @ w_mid[l].T + b_mid[l], 0.0)
    ref_f32 = jnp.tanh(y32 @ w_out.T + b_out).reshape(B, N, hidden_channels, input_dim)

    err_bf16 = float(jnp.max(jnp.abs(out - ref_bf16)))
    err_f32 = float(jnp.max(jnp.abs(out - ref_f32)))
    assert jnp.allclose(out, ref_bf16, atol=5e-3, rtol=5e-3), err_bf16
    assert jnp.allclose(out, ref_f32, atol=5e-2, rtol=5e-2), err_f32

    print("KERNEL_OK")
</pallas_src>

<mosaic_0001>
module attributes {stable_mosaic.version = 11 : i64} {
  func.func @kernel(%arg0: i32, %arg1: memref<8x32xf32, #tpu.memory_space<vmem>>, %arg2: memref<32x32xbf16, #tpu.memory_space<vmem>>, %arg3: memref<1x32xf32, #tpu.memory_space<vmem>>, %arg4: memref<1x32x32xbf16, #tpu.memory_space<vmem>>, %arg5: memref<1x1x32xf32, #tpu.memory_space<vmem>>, %arg6: memref<32x128xbf16, #tpu.memory_space<vmem>>, %arg7: memref<1x128xf32, #tpu.memory_space<vmem>>, %arg8: memref<8x128xf32, #tpu.memory_space<vmem>>) attributes {dimension_semantics = [#tpu.dimension_semantics<parallel>], iteration_bounds = array<i64: 4>, scalar_prefetch = 0 : i64, scratch_operands = 0 : i64, tpu.core_type = #tpu.core_type<tc>, window_params = [{transform_indices = @transform_0, window_bounds = array<i64: 8, 32>}, {pipeline_mode = #tpu.pipeline_mode<synchronous>, transform_indices = @transform_1, window_bounds = array<i64: 32, 32>}, {pipeline_mode = #tpu.pipeline_mode<synchronous>, transform_indices = @transform_2, window_bounds = array<i64: 1, 32>}, {pipeline_mode = #tpu.pipeline_mode<synchronous>, transform_indices = @transform_3, window_bounds = array<i64: 1, 32, 32>}, {pipeline_mode = #tpu.pipeline_mode<synchronous>, transform_indices = @transform_4, window_bounds = array<i64: 1, 1, 32>}, {pipeline_mode = #tpu.pipeline_mode<synchronous>, transform_indices = @transform_5, window_bounds = array<i64: 32, 128>}, {pipeline_mode = #tpu.pipeline_mode<synchronous>, transform_indices = @transform_6, window_bounds = array<i64: 1, 128>}, {transform_indices = @transform_7, window_bounds = array<i64: 8, 128>}]} {
    %c0 = arith.constant 0 : index
    %c0_0 = arith.constant 0 : index
    %0 = vector.load %arg1[%c0, %c0_0] : memref<8x32xf32, #tpu.memory_space<vmem>>, vector<8x32xf32>
    %1 = arith.truncf %0 : vector<8x32xf32> to vector<8x32xbf16>
    %c0_1 = arith.constant 0 : index
    %c0_2 = arith.constant 0 : index
    %2 = vector.load %arg2[%c0_1, %c0_2] : memref<32x32xbf16, #tpu.memory_space<vmem>>, vector<32x32xbf16>
    %cst = arith.constant dense<0.000000e+00> : vector<8x32xf32>
    %3 = tpu.matmul %1, %2, %cst {dimension_numbers = #tpu.dot_dimension_numbers<[1], [0], [0], [1], [0, 0, 1, 1], [], []>} : vector<8x32xbf16>, vector<32x32xbf16>, vector<8x32xf32> -> vector<8x32xf32>
    %c0_3 = arith.constant 0 : index
    %c0_4 = arith.constant 0 : index
    %4 = vector.load %arg3[%c0_3, %c0_4] : memref<1x32xf32, #tpu.memory_space<vmem>>, vector<1x32xf32>
    %5 = vector.broadcast %4 : vector<1x32xf32> to vector<8x32xf32>
    %6 = arith.addf %3, %5 : vector<8x32xf32>
    %cst_5 = arith.constant 0.000000e+00 : f32
    %7 = vector.broadcast %cst_5 : f32 to vector<8x32xf32>
    %8 = arith.maximumf %6, %7 : vector<8x32xf32>
    %9 = arith.truncf %8 : vector<8x32xf32> to vector<8x32xbf16>
    %c0_6 = arith.constant 0 : index
    %c0_7 = arith.constant 0 : index
    %c0_8 = arith.constant 0 : index
    %10 = vector.load %arg4[%c0_6, %c0_7, %c0_8] : memref<1x32x32xbf16, #tpu.memory_space<vmem>>, vector<1x32x32xbf16>
    %11 = vector.shape_cast %10 : vector<1x32x32xbf16> to vector<32x32xbf16>
    %cst_9 = arith.constant dense<0.000000e+00> : vector<8x32xf32>
    %12 = tpu.matmul %9, %11, %cst_9 {dimension_numbers = #tpu.dot_dimension_numbers<[1], [0], [0], [1], [0, 0, 1, 1], [], []>} : vector<8x32xbf16>, vector<32x32xbf16>, vector<8x32xf32> -> vector<8x32xf32>
    %c0_10 = arith.constant 0 : index
    %c0_11 = arith.constant 0 : index
    %c0_12 = arith.constant 0 : index
    %13 = vector.load %arg5[%c0_10, %c0_11, %c0_12] : memref<1x1x32xf32, #tpu.memory_space<vmem>>, vector<1x1x32xf32>
    %14 = vector.shape_cast %13 : vector<1x1x32xf32> to vector<1x32xf32>
    %15 = vector.broadcast %14 : vector<1x32xf32> to vector<8x32xf32>
    %16 = arith.addf %12, %15 : vector<8x32xf32>
    %cst_13 = arith.constant 0.000000e+00 : f32
    %17 = vector.broadcast %cst_13 : f32 to vector<8x32xf32>
    %18 = arith.maximumf %16, %17 : vector<8x32xf32>
    %19 = arith.truncf %18 : vector<8x32xf32> to vector<8x32xbf16>
    %c0_14 = arith.constant 0 : index
    %c0_15 = arith.constant 0 : index
    %20 = vector.load %arg6[%c0_14, %c0_15] : memref<32x128xbf16, #tpu.memory_space<vmem>>, vector<32x128xbf16>
    %cst_16 = arith.constant dense<0.000000e+00> : vector<8x128xf32>
    %21 = tpu.matmul %19, %20, %cst_16 {dimension_numbers = #tpu.dot_dimension_numbers<[1], [0], [0], [1], [0, 0, 1, 1], [], []>} : vector<8x32xbf16>, vector<32x128xbf16>, vector<8x128xf32> -> vector<8x128xf32>
    %c0_17 = arith.constant 0 : index
    %c0_18 = arith.constant 0 : index
    %22 = vector.load %arg7[%c0_17, %c0_18] : memref<1x128xf32, #tpu.memory_space<vmem>>, vector<1x128xf32>
    %23 = vector.broadcast %22 : vector<1x128xf32> to vector<8x128xf32>
    %24 = arith.addf %21, %23 : vector<8x128xf32>
    %25 = math.tanh %24 : vector<8x128xf32>
    %c0_19 = arith.constant 0 : index
    %c0_20 = arith.constant 0 : index
    %26 = vector.load %arg8[%c0_19, %c0_20] : memref<8x128xf32, #tpu.memory_space<vmem>>, vector<8x128xf32>
    tpu.vector_store %arg8[%c0_19, %c0_20], %25 {strides = array<i32>} : memref<8x128xf32, #tpu.memory_space<vmem>>, vector<8x128xf32>,
    return
  }
  func.func @transform_0(%arg0: i32) -> (i32, i32) {
    %c0_i32 = arith.constant 0 : i32
    %c0_i32_0 = arith.constant 0 : i32
    return %arg0, %c0_i32 : i32, i32
  }
  func.func @transform_1(%arg0: i32) -> (i32, i32) {
    %c0_i32 = arith.constant 0 : i32
    %c0_i32_0 = arith.constant 0 : i32
    %c0_i32_1 = arith.constant 0 : i32
    return %c0_i32, %c0_i32_0 : i32, i32
  }
  func.func @transform_2(%arg0: i32) -> (i32, i32) {
    %c0_i32 = arith.constant 0 : i32
    %c0_i32_0 = arith.constant 0 : i32
    %c0_i32_1 = arith.constant 0 : i32
    return %c0_i32, %c0_i32_0 : i32, i32
  }
  func.func @transform_3(%arg0: i32) -> (i32, i32, i32) {
    %c0_i32 = arith.constant 0 : i32
    %c0_i32_0 = arith.constant 0 : i32
    %c0_i32_1 = arith.constant 0 : i32
    %c0_i32_2 = arith.constant 0 : i32
    return %c0_i32, %c0_i32_0, %c0_i32_1 : i32, i32, i32
  }
  func.func @transform_4(%arg0: i32) -> (i32, i32, i32) {
    %c0_i32 = arith.constant 0 : i32
    %c0_i32_0 = arith.constant 0 : i32
    %c0_i32_1 = arith.constant 0 : i32
    %c0_i32_2 = arith.constant 0 : i32
    return %c0_i32, %c0_i32_0, %c0_i32_1 : i32, i32, i32
  }
  func.func @transform_5(%arg0: i32) -> (i32, i32) {
    %c0_i32 = arith.constant 0 : i32
    %c0_i32_0 = arith.constant 0 : i32
    %c0_i32_1 = arith.constant 0 : i32
    return %c0_i32, %c0_i32_0 : i32, i32
  }
  func.func @transform_6(%arg0: i32) -> (i32, i32) {
    %c0_i32 = arith.constant 0 : i32
    %c0_i32_0 = arith.constant 0 : i32
    %c0_i32_1 = arith.constant 0 : i32
    return %c0_i32, %c0_i32_0 : i32, i32
  }
  func.func @transform_7(%arg0: i32) -> (i32, i32) {
    %c0_i32 = arith.constant 0 : i32
    %c0_i32_0 = arith.constant 0 : i32
    return %arg0, %c0_i32 : i32, i32
  }
}

</mosaic_0001>

<bundles_post_ra>
// kernel: f_conv_forward.1
= control target key start
LH: loop header
LB: loop body
LE: loop exit
PB: predicated region body
PF: predicated region fallthrough
CT: control target
= control target key end

     0   :  { %s657_s24 = smov 0   ;;  %s711_s0 = inlined_call_operand.vmem [shape: f32[32,32], index: 0, kind: input, shape index: {}]   ;;  %s712_s1 = inlined_call_operand.vmem [shape: bf16[32,32], index: 1, kind: input, shape index: {}]   ;;  %s713_s2 = inlined_call_operand.vmem [shape: f32[1,32], index: 2, kind: input, shape index: {}]   ;;  %s714_s3 = inlined_call_operand.vmem [shape: bf16[1,32,32], index: 3, kind: input, shape index: {}]   ;;  %s715_s4 = inlined_call_operand.vmem [shape: f32[1,1,32], index: 4, kind: input, shape index: {}]   ;;  %s716_s5 = inlined_call_operand.vmem [shape: bf16[32,128], index: 5, kind: input, shape index: {}]   ;;  %s717_s6 = inlined_call_operand.vmem [shape: f32[1,128], index: 6, kind: input, shape index: {}]   ;;  %s718_s7 = inlined_call_operand.vmem [shape: f32[32,128], index: 7, kind: output, shape index: {}]  }
   0x1 LB: > { %s535_s25 = sadd.s32 4294967295, %s613_s24   ;;  %p539_p0 = scmp.ge.s32.totalorder %s613_s24, 1  ;;  %s613_s24 = sphi %s657_s24, %s17_s24  }
   0x2   : > { %p236_p1 = scmp.lt.s32.totalorder %s613_s24, 5 }
   0x4   : > { %p237_p2 = pnand %p539_p0, %p236_p1 }
   0x5   : > { %p266_p3 = scmp.lt.s32.totalorder (!%p237_p2), %s535_s25, 3 }
   0x6   : > { %240 = sbr.rel (%p237_p2) target bundleno = 628 (0x274), region = 48 }
   0xb   : > { %v599_v0 = vld [vmem:[%s712_s1 + $0x8] sm:$0xff]   ;;  %v615_v1 = vmov 0.0   ;;  %v600_v2 = vld [vmem:[%s712_s1] sm:$0xff]   ;;  %vm616_vm0 = vmmov 0   ;;  %s720_s25 = smov (!%p266_p3, %s535_s25), 3  ;;  %vm300_vm1 = vcmask 261120  }
   0xc   : > { %565 = vmatprep.subr.bf16.mxu0 %v615_v1  ;;  %573 = vmatprep.subr.bf16.mxu1 %v615_v1  ;;  %s540_s30 = sshll.u32 %s720_s25, 3  ;;  %v601_v5 = vld [vmem:[%s714_s3 + $0x8] sm:$0xff]   ;;  %v602_v6 = vld [vmem:[%s714_s3] sm:$0xff]  }
   0xd   : > { %566 = vmatpush3.bf16.msra.mxu0 %v599_v0  ;;  %569 = vmatprep.mubr.msk.bf16.mxu0 %vm616_vm0, %v615_v1  ;;  %s269_s10 = scalar_lea.vmem %s711_s0, %s540_s30  ;;  %v603_v7 = vld [vmem:[%s716_s5 + $0x8] sm:$0xff]   ;;  %v542_v8 = vld [vmem:[%s713_s2] ss:$0 sm:$0xff]  ;;  %s273_s29 = scalar_lea.vmem %s718_s7, %s540_s30 }
   0xe   : > { %567 = vmatprep.subr.bf16.mxu0 %v615_v1  ;;  %577 = vmatprep.mubr.msk.bf16.mxu1 %vm616_vm0, %v615_v1  ;;  %v275_v3 = vld [vmem:[%s269_s10] sm:$0xff] }
   0xf   : > { %v276_v4 = vpack.c.bf16 %v275_v3, %v275_v3  ;;  %574 = vmatpush3.bf16.msra.mxu1 %v601_v5  ;;  %v604_v16 = vld [vmem:[%s716_s5] sm:$0xff]  }
  0x10   : > { %575 = vmatprep.subr.bf16.mxu1 %v615_v1  ;;  %v546_v17 = vld [vmem:[%s715_s4] ss:$0 sm:$0xff] }
  0x11   : > { %568 = vmatpush3.bf16.msra.mxu0 %v600_v2  ;;  %v550_v25 = vld [vmem:[%s717_s6] ss:$0 sm:$0xff] }
  0x12   : > { %581 = vmatprep.subr.bf16.mxu0 %v615_v1 }
  0x13   : > { %576 = vmatpush3.bf16.msra.mxu1 %v602_v6 }
  0x14   : > { %570 = vmatmul.mubr.msk.bf16.vlgmr.msra.gmra.mxu0 %vm300_vm1, %v276_v4 }
  0x15   : > { %585 = vmatprep.mubr.msk.bf16.mxu0 %vm616_vm0, %v615_v1  ;;  %582 = vmatpush3.bf16.msra.mxu0 %v603_v7 }
  0x16   : > { %583 = vmatprep.subr.bf16.mxu0 %v615_v1 }
  0x19   : > { %584 = vmatpush3.bf16.msra.mxu0 %v604_v16 }
  0xd4   : > { %v338_v9 = vpop.f32.mrf.mxu0 }
  0xd5   : > { %v339_v10 = vadd.f32 %v542_v8, %v338_v9 }
  0xd6   : > { %v571_v11 = vpop.f32.mrf.mxu0 }
  0xd7   : > { %v344_v12 = vmax.f32 %v339_v10, 0.0 }
  0xd8   : > { %v341_v13 = vpop.f32.mrf.mxu0 }
  0xd9   : > { %v345_v14 = vpack.c.bf16 %v344_v12, %v344_v12 }
  0xda   : > { %v572_v15 = vpop.f32.mrf.mxu0 }
  0xdb   : > { %578 = vmatmul.mubr.msk.bf16.vlgmr.msra.gmra.mxu1 %vm300_vm1, %v345_v14 }
 0x19b   : > { %v406_v18 = vpop.f32.mrf.mxu1 }
 0x19c   : > { %v407_v19 = vadd.f32 %v546_v17, %v406_v18 }
 0x19d   : > { %v579_v20 = vpop.f32.mrf.mxu1 }
 0x19e   : > { %v412_v21 = vmax.f32 %v407_v19, 0.0 }
 0x19f   : > { %v409_v22 = vpop.f32.mrf.mxu1 }
 0x1a0   : > { %v413_v23 = vpack.c.bf16 %v412_v21, %v412_v21 }
 0x1a1   : > { %v580_v24 = vpop.f32.mrf.mxu1 }
 0x1a2   : > { %586 = vmatmul.mubr.msk.bf16.vlgmr.msra.gmra.mxu0 %vm300_vm1, %v413_v23 }
 0x262   : > { %v474_v26 = vpop.f32.mrf.mxu0 }
 0x263   : > { %v475_v27 = vadd.f32 %v550_v25, %v474_v26 }
 0x264   : > { %v587_v28 = vpop.f32.mrf.mxu0 }
 0x265   : > { %605 = vtanh.f32 %v475_v27 }
 0x266   : > { %v477_v29 = vpop.f32.mrf.mxu0 }
 0x268   : > { %v588_v30 = vpop.f32.mrf.mxu0 }
 0x272   : > { %v606_v31 = vpop.eup %605 }
 0x273   : > { %481 = vst [vmem:[%s273_s29] sm:$0xff] %v606_v31 }
 0x274 PF: > { %s17_s24 = sadd.s32 1, %s613_s24  }
 0x275   : > { %p14_p4 = scmp.ge.s32.totalorder %s17_s24, 6  }
 0x277   :  { %16 = sbr.rel (!%p14_p4) target bundleno = 1 (0x1), region = 78 }

</bundles_post_ra>
